<compile_context>
chip_gen: v7x
topology: tpu7x:2x2x1
jax: 0.10.0
libtpu: 0.0.40
codegen_flags: <defaults>
</compile_context>

<pallas_src>
import functools

import jax
import jax.numpy as jnp
from jax.experimental import pallas as pl
from jax.experimental.pallas import tpu as pltpu


FEAT = 28 * 28      # 784 (nn.Flatten of (1, 28, 28))
HID = 16
OUT = 10
WPAD = 128          # lane-dense width used for all hidden/output feature dims


def _round_up(n, m):
    return ((n + m - 1) // m) * m


@functools.lru_cache(maxsize=1)
def _vmem_capacity_bytes():
    try:
        return int(getattr(pltpu.get_tpu_info(), "vmem_capacity_bytes", 64 << 20))
    except Exception:
        return 64 << 20     # conservative fallback (assume small-VMEM chip)


def _mlp_kernel(x_ref, w1_ref, wh_ref, b_ref, o_ref):
    """One (TB, 784) batch tile through the fused 4-layer MLP.

    x_ref : (TB, 784)     input tile (f32 or bf16), streamed per grid step
    w1_ref: (784, 128)    layer-1 weight, zero-padded 16->128 cols, bf16, pinned
    wh_ref: (3, 128, 128) layers 2-4 weights, zero-padded, bf16, pinned
    b_ref : (4, 128)      all biases, zero-padded, f32, pinned
    o_ref : (TB, 128)     lane-dense output tile (cols 10.. stay zero)
    """
    x = x_ref[...].astype(jnp.bfloat16)
    b = b_ref[...]                                   # (4, 128) f32
    h = jnp.dot(x, w1_ref[...], preferred_element_type=jnp.float32)
    h = jnp.maximum(h + b[0:1, :], 0.0)
    for l in range(3):                               # layers 2..4, unrolled
        h = jnp.dot(h.astype(jnp.bfloat16), wh_ref[l],
                    preferred_element_type=jnp.float32)
        h = jnp.maximum(h + b[l + 1:l + 2, :], 0.0)  # module ReLUs after every layer
    o_ref[...] = h.astype(o_ref.dtype)               # full unmasked 128-lane store


def example_net_2_forward(x, params):
    """x: (B, 1, 28, 28) float32 (NCHW, like PyTorch). Returns (B, 10) float32."""
    w1, b1, w2, b2, w3, b3, w4, b4 = params
    B = x.shape[0]
    x_flat = x.reshape(B, -1)                        # nn.Flatten; no copy, no cast pass
    assert x_flat.shape[1] == FEAT

    # Tiny batches only: pad rows to the 8-sublane minimum (<= 7 extra rows).
    if B < 8:
        x_flat = jnp.pad(x_flat, ((0, 8 - B), (0, 0)))
    brows = x_flat.shape[0]

    # Prepare the (tiny) weights: zero-pad feature dims to 128 lanes (exact math,
    # padded lanes stay zero through ReLU) and consolidate into 3 pinned operands.
    w1_p = jnp.pad(w1, ((0, 0), (0, WPAD - HID))).astype(jnp.bfloat16)         # (784,128)
    w2_p = jnp.pad(w2, ((0, WPAD - HID), (0, WPAD - HID)))
    w3_p = jnp.pad(w3, ((0, WPAD - HID), (0, WPAD - HID)))
    w4_p = jnp.pad(w4, ((0, WPAD - HID), (0, WPAD - OUT)))
    wh = jnp.stack([w2_p, w3_p, w4_p], axis=0).astype(jnp.bfloat16)            # (3,128,128)
    b_all = jnp.concatenate(
        [jnp.pad(b1, ((0, 0), (0, WPAD - HID))),
         jnp.pad(b2, ((0, 0), (0, WPAD - HID))),
         jnp.pad(b3, ((0, 0), (0, WPAD - HID))),
         jnp.pad(b4, ((0, 0), (0, WPAD - OUT)))], axis=0).astype(jnp.float32)  # (4,128)

    # --- generation-aware batch tile: big-VMEM chips (v5e/v6e) take the largest
    # tile; small-VMEM chips (v7x, 2 TCs) cap at 1024 and get >=2 grid steps. ---
    big_vmem = _vmem_capacity_bytes() >= (100 << 20)
    cap = 2048 if big_vmem else 1024
    tb = min(cap, _round_up(brows, 8))
    if (not big_vmem) and brows >= 16 and pl.cdiv(brows, tb) < 2:
        tb = _round_up(pl.cdiv(brows, 2), 8)
    grid = (pl.cdiv(brows, tb),)   # ragged last tile is masked by Pallas; rows are
                                   # independent so padded rows never leak into [:B].

    x_spec = pl.BlockSpec((tb, FEAT), lambda i: (i, 0))
    pinned = lambda a: pl.BlockSpec(a.shape, lambda i: (0,) * a.ndim)
    out_spec = pl.BlockSpec((tb, WPAD), lambda i: (i, 0))

    xbytes = jnp.dtype(x_flat.dtype).itemsize
    flops = int(2 * brows * (FEAT * WPAD + 3 * WPAD * WPAD))
    bytes_accessed = int(brows * FEAT * xbytes
                         + w1_p.size * 2 + wh.size * 2 + b_all.size * 4
                         + brows * WPAD * 4)
    cost = pl.CostEstimate(flops=flops, transcendentals=0,
                           bytes_accessed=bytes_accessed)

    out_padded = pl.pallas_call(
        _mlp_kernel,
        out_shape=jax.ShapeDtypeStruct((brows, WPAD), jnp.float32),
        grid=grid,
        in_specs=[x_spec, pinned(w1_p), pinned(wh), pinned(b_all)],
        out_specs=out_spec,
        compiler_params=pltpu.CompilerParams(
            dimension_semantics=("parallel",),
            vmem_limit_bytes=(64 << 20) if big_vmem else None),
        cost_estimate=cost,
    )(x_flat, w1_p, wh, b_all)

    return out_padded[:B, :OUT]


def init_params(key):
    """Deterministic init matching nn.Linear default: U(-1/sqrt(fan_in), +1/sqrt(fan_in))."""
    dims = [(FEAT, HID), (HID, HID), (HID, HID), (HID, OUT)]
    params = []
    for (fan_in, fan_out) in dims:
        key, kw, kb = jax.random.split(key, 3)
        bound = 1.0 / (fan_in ** 0.5)
        w = jax.random.uniform(kw, (fan_in, fan_out), jnp.float32, -bound, bound)
        b = jax.random.uniform(kb, (1, fan_out), jnp.float32, -bound, bound)
        params.extend([w, b])
    return tuple(params)


def _reference_forward(x, params):
    """Pure-JAX f32 reference for a sanity check."""
    w1, b1, w2, b2, w3, b3, w4, b4 = params
    h = x.reshape(x.shape[0], -1)
    for w, b in ((w1, b1), (w2, b2), (w3, b3), (w4, b4)):
        h = jnp.maximum(h @ w + b, 0.0)
    return h


if __name__ == "__main__":
    key = jax.random.PRNGKey(0)
    k_in, k_params = jax.random.split(key)

    # Small batch, MNIST-shaped input implied by the 28*28 flatten: (B, 1, 28, 28)
    x = jax.random.normal(k_in, (2, 1, 28, 28), jnp.float32)
    params = init_params(k_params)

    out = example_net_2_forward(x, params)
    out = jax.block_until_ready(out)

    ref = _reference_forward(x, params)
    assert out.shape == (2, 10)
    # bf16 MXU passes (both in the kernel and in XLA's default-precision reference)
    # -> compare with a matching tolerance.
    assert jnp.allclose(out, ref, atol=2e-2, rtol=2e-2), (
        f"max abs diff {float(jnp.max(jnp.abs(out - ref)))}")

    print("KERNEL_OK")
</pallas_src>

<mosaic_0001>
module attributes {stable_mosaic.version = 11 : i64} {
  func.func @_mlp_kernel(%arg0: i32, %arg1: memref<8x784xf32, #tpu.memory_space<vmem>>, %arg2: memref<784x128xbf16, #tpu.memory_space<vmem>>, %arg3: memref<3x128x128xbf16, #tpu.memory_space<vmem>>, %arg4: memref<4x128xf32, #tpu.memory_space<vmem>>, %arg5: memref<8x128xf32, #tpu.memory_space<vmem>>) attributes {dimension_semantics = [#tpu.dimension_semantics<parallel>], iteration_bounds = array<i64: 1>, scalar_prefetch = 0 : i64, scratch_operands = 0 : i64, tpu.core_type = #tpu.core_type<tc>, window_params = [{transform_indices = @transform_0, window_bounds = array<i64: 8, 784>}, {pipeline_mode = #tpu.pipeline_mode<synchronous>, transform_indices = @transform_1, window_bounds = array<i64: 784, 128>}, {pipeline_mode = #tpu.pipeline_mode<synchronous>, transform_indices = @transform_2, window_bounds = array<i64: 3, 128, 128>}, {pipeline_mode = #tpu.pipeline_mode<synchronous>, transform_indices = @transform_3, window_bounds = array<i64: 4, 128>}, {transform_indices = @transform_4, window_bounds = array<i64: 8, 128>}]} {
    %c0 = arith.constant 0 : index
    %c0_0 = arith.constant 0 : index
    %0 = vector.load %arg1[%c0, %c0_0] : memref<8x784xf32, #tpu.memory_space<vmem>>, vector<8x784xf32>
    %1 = arith.truncf %0 : vector<8x784xf32> to vector<8x784xbf16>
    %c0_1 = arith.constant 0 : index
    %c0_2 = arith.constant 0 : index
    %2 = vector.load %arg4[%c0_1, %c0_2] : memref<4x128xf32, #tpu.memory_space<vmem>>, vector<4x128xf32>
    %c0_3 = arith.constant 0 : index
    %c0_4 = arith.constant 0 : index
    %3 = vector.load %arg2[%c0_3, %c0_4] : memref<784x128xbf16, #tpu.memory_space<vmem>>, vector<784x128xbf16>
    %cst = arith.constant dense<0.000000e+00> : vector<8x128xf32>
    %4 = tpu.matmul %1, %3, %cst {dimension_numbers = #tpu.dot_dimension_numbers<[1], [0], [0], [1], [0, 0, 1, 1], [], []>} : vector<8x784xbf16>, vector<784x128xbf16>, vector<8x128xf32> -> vector<8x128xf32>
    %5 = vector.extract_strided_slice %2 {offsets = [0, 0], sizes = [1, 128], strides = [1, 1]} : vector<4x128xf32> to vector<1x128xf32>
    %6 = vector.broadcast %5 : vector<1x128xf32> to vector<8x128xf32>
    %7 = arith.addf %4, %6 : vector<8x128xf32>
    %cst_5 = arith.constant 0.000000e+00 : f32
    %8 = vector.broadcast %cst_5 : f32 to vector<8x128xf32>
    %9 = arith.maximumf %7, %8 : vector<8x128xf32>
    %10 = arith.truncf %9 : vector<8x128xf32> to vector<8x128xbf16>
    %c0_6 = arith.constant 0 : index
    %c0_7 = arith.constant 0 : index
    %c0_8 = arith.constant 0 : index
    %11 = vector.load %arg3[%c0_6, %c0_7, %c0_8] : memref<3x128x128xbf16, #tpu.memory_space<vmem>>, vector<1x128x128xbf16>
    %12 = vector.shape_cast %11 : vector<1x128x128xbf16> to vector<128x128xbf16>
    %cst_9 = arith.constant dense<0.000000e+00> : vector<8x128xf32>
    %13 = tpu.matmul %10, %12, %cst_9 {dimension_numbers = #tpu.dot_dimension_numbers<[1], [0], [0], [1], [0, 0, 1, 1], [], []>} : vector<8x128xbf16>, vector<128x128xbf16>, vector<8x128xf32> -> vector<8x128xf32>
    %14 = vector.extract_strided_slice %2 {offsets = [1, 0], sizes = [1, 128], strides = [1, 1]} : vector<4x128xf32> to vector<1x128xf32>
    %15 = vector.broadcast %14 : vector<1x128xf32> to vector<8x128xf32>
    %16 = arith.addf %13, %15 : vector<8x128xf32>
    %cst_10 = arith.constant 0.000000e+00 : f32
    %17 = vector.broadcast %cst_10 : f32 to vector<8x128xf32>
    %18 = arith.maximumf %16, %17 : vector<8x128xf32>
    %19 = arith.truncf %18 : vector<8x128xf32> to vector<8x128xbf16>
    %c1 = arith.constant 1 : index
    %c0_11 = arith.constant 0 : index
    %c0_12 = arith.constant 0 : index
    %20 = vector.load %arg3[%c1, %c0_11, %c0_12] : memref<3x128x128xbf16, #tpu.memory_space<vmem>>, vector<1x128x128xbf16>
    %21 = vector.shape_cast %20 : vector<1x128x128xbf16> to vector<128x128xbf16>
    %cst_13 = arith.constant dense<0.000000e+00> : vector<8x128xf32>
    %22 = tpu.matmul %19, %21, %cst_13 {dimension_numbers = #tpu.dot_dimension_numbers<[1], [0], [0], [1], [0, 0, 1, 1], [], []>} : vector<8x128xbf16>, vector<128x128xbf16>, vector<8x128xf32> -> vector<8x128xf32>
    %23 = vector.extract_strided_slice %2 {offsets = [2, 0], sizes = [1, 128], strides = [1, 1]} : vector<4x128xf32> to vector<1x128xf32>
    %24 = vector.broadcast %23 : vector<1x128xf32> to vector<8x128xf32>
    %25 = arith.addf %22, %24 : vector<8x128xf32>
    %cst_14 = arith.constant 0.000000e+00 : f32
    %26 = vector.broadcast %cst_14 : f32 to vector<8x128xf32>
    %27 = arith.maximumf %25, %26 : vector<8x128xf32>
    %28 = arith.truncf %27 : vector<8x128xf32> to vector<8x128xbf16>
    %c2 = arith.constant 2 : index
    %c0_15 = arith.constant 0 : index
    %c0_16 = arith.constant 0 : index
    %29 = vector.load %arg3[%c2, %c0_15, %c0_16] : memref<3x128x128xbf16, #tpu.memory_space<vmem>>, vector<1x128x128xbf16>
    %30 = vector.shape_cast %29 : vector<1x128x128xbf16> to vector<128x128xbf16>
    %cst_17 = arith.constant dense<0.000000e+00> : vector<8x128xf32>
    %31 = tpu.matmul %28, %30, %cst_17 {dimension_numbers = #tpu.dot_dimension_numbers<[1], [0], [0], [1], [0, 0, 1, 1], [], []>} : vector<8x128xbf16>, vector<128x128xbf16>, vector<8x128xf32> -> vector<8x128xf32>
    %32 = vector.extract_strided_slice %2 {offsets = [3, 0], sizes = [1, 128], strides = [1, 1]} : vector<4x128xf32> to vector<1x128xf32>
    %33 = vector.broadcast %32 : vector<1x128xf32> to vector<8x128xf32>
    %34 = arith.addf %31, %33 : vector<8x128xf32>
    %cst_18 = arith.constant 0.000000e+00 : f32
    %35 = vector.broadcast %cst_18 : f32 to vector<8x128xf32>
    %36 = arith.maximumf %34, %35 : vector<8x128xf32>
    %c0_19 = arith.constant 0 : index
    %c0_20 = arith.constant 0 : index
    %37 = vector.load %arg5[%c0_19, %c0_20] : memref<8x128xf32, #tpu.memory_space<vmem>>, vector<8x128xf32>
    tpu.vector_store %arg5[%c0_19, %c0_20], %36 {strides = array<i32>} : memref<8x128xf32, #tpu.memory_space<vmem>>, vector<8x128xf32>,
    return
  }
  func.func @transform_0(%arg0: i32) -> (i32, i32) {
    %c0_i32 = arith.constant 0 : i32
    %c0_i32_0 = arith.constant 0 : i32
    return %arg0, %c0_i32 : i32, i32
  }
  func.func @transform_1(%arg0: i32) -> (i32, i32) {
    %c0_i32 = arith.constant 0 : i32
    %c0_i32_0 = arith.constant 0 : i32
    %c0_i32_1 = arith.constant 0 : i32
    return %c0_i32, %c0_i32_0 : i32, i32
  }
  func.func @transform_2(%arg0: i32) -> (i32, i32, i32) {
    %c0_i32 = arith.constant 0 : i32
    %c0_i32_0 = arith.constant 0 : i32
    %c0_i32_1 = arith.constant 0 : i32
    %c0_i32_2 = arith.constant 0 : i32
    return %c0_i32, %c0_i32_0, %c0_i32_1 : i32, i32, i32
  }
  func.func @transform_3(%arg0: i32) -> (i32, i32) {
    %c0_i32 = arith.constant 0 : i32
    %c0_i32_0 = arith.constant 0 : i32
    %c0_i32_1 = arith.constant 0 : i32
    return %c0_i32, %c0_i32_0 : i32, i32
  }
  func.func @transform_4(%arg0: i32) -> (i32, i32) {
    %c0_i32 = arith.constant 0 : i32
    %c0_i32_0 = arith.constant 0 : i32
    return %arg0, %c0_i32 : i32, i32
  }
}

</mosaic_0001>

<bundles_post_ra>
// kernel: tpu_custom_call.1
= control target key start
LH: loop header
LB: loop body
LE: loop exit
PB: predicated region body
PF: predicated region fallthrough
CT: control target
= control target key end

     0   :  { %9 = vsyncpa [#allocation3], 0  ;;  %s1528_s0 = inlined_call_operand.hbm [shape: f32[8,784], index: 0, kind: input, shape index: {}]   ;;  %s1529_s1 = inlined_call_operand.hbm [shape: bf16[784,128], index: 1, kind: input, shape index: {}]   ;;  %s1530_s2 = inlined_call_operand.hbm [shape: bf16[3,128,128], index: 2, kind: input, shape index: {}]   ;;  %s1531_s3 = inlined_call_operand.vmem [shape: f32[4,128], index: 3, kind: input, shape index: {}]   ;;  %s1532_s4 = inlined_call_operand.hbm [shape: f32[8,128], index: 4, kind: output, shape index: {}]  }
   0x1   :  { %10 = vsyncpa [#allocation6], 0 }
   0x2   :  { %11 = vsyncpa [#allocation4], 0  ;;  %s1393_s15 = smov [#allocation5]   ;;  %s1299_s19 = scalar_lea.hbm %s1529_s1, 6272 }
   0x3   :  { %s27_s16 = sshll.u32 %s1393_s15, 4  ;;  %p1300_p0 = scmp.ne.s32.totalorder %s1529_s1, %s1299_s19  ;;  %s28_s16 = int_to_ptr.vmem [resolvable:$true] %s27_s16 }
   0x4   :  { %p1303_p1 = scmp.lt.u32.totalorder %s1299_s19, %s1529_s1 }
   0x6   :  { %p1305_p2 = pnand %p1303_p1, %p1300_p0 }
   0x8   :  { %1308 = shalt.err (!%p1305_p2)
}
   0x9   :  { %s1309_s24 = scalar_lea.vmem %s28_s16, 6272  ;;  %p1314_p4 = scmp.lt.s32.totalorder %s28_s16, %s28_s16 }
   0xa   :  { %p1310_p3 = scmp.ne.s32.totalorder %s28_s16, %s1309_s24  ;;  %p1315_p5 = scmp.lt.s32.totalorder %s1309_s24, %s1309_s24 }
   0xc   :  { %p1316_p6 = por %p1315_p5, %p1314_p4 }
   0xe   :  { %p1317_p7 = pnand %p1316_p6, %p1310_p3 }
  0x10   :  { %1320 = shalt.err (!%p1317_p7)
}
  0x11   :  { %s1394_s25 = smov 64   ;;  %s1395_s26 = smov 4  }
  0x12   :  { %33 = dma.hbm_to_vmem [thread:$0]  %s1529_s1, 6272, %s28_s16, [#allocation6], %s1394_s25, %s1394_s25, %s1395_s26  }
  0x13   :  { %s1396_s29 = smov [#allocation2]   ;;  %s1397_s5 = smov [#allocation7]  }
  0x14   :  { %s18_s30 = sshll.u32 %s1396_s29, 4  ;;  %s39_s6 = sshll.u32 %s1397_s5, 4  ;;  %s19_s30 = int_to_ptr.vmem [resolvable:$true] %s18_s30  ;;  %s40_s6 = int_to_ptr.vmem [resolvable:$true] %s39_s6 }
  0x15   :  { %s1321_s9 = scalar_lea.hbm %s1528_s0, 896 }
  0x16   :  { %p1322_p8 = scmp.ne.s32.totalorder %s1528_s0, %s1321_s9  ;;  %p1325_p9 = scmp.lt.u32.totalorder %s1321_s9, %s1528_s0 }
  0x18   :  { %p1327_p10 = pnand %p1325_p9, %p1322_p8 }
  0x1a   :  { %1330 = shalt.err (!%p1327_p10)
}
  0x1b   :  { %s1331_s1 = scalar_lea.vmem %s19_s30, 896  ;;  %p1336_p12 = scmp.lt.s32.totalorder %s19_s30, %s19_s30 }
  0x1c   :  { %p1332_p11 = scmp.ne.s32.totalorder %s19_s30, %s1331_s1  ;;  %p1337_p13 = scmp.lt.s32.totalorder %s1331_s1, %s1331_s1 }
  0x1e   :  { %p1338_p0 = por %p1337_p13, %p1336_p12 }
  0x20   :  { %p1339_p1 = pnand %p1338_p0, %p1332_p11 }
  0x22   :  { %1342 = shalt.err (!%p1339_p1)
}
  0x23   :  { %21 = dma.hbm_to_vmem [thread:$0]  %s1528_s0, 896, %s19_s30, [#allocation3]  }
  0x24   :  { %s1343_s18 = scalar_lea.hbm %s1530_s2, 3072 }
  0x25   :  { %p1344_p2 = scmp.ne.s32.totalorder %s1530_s2, %s1343_s18  ;;  %p1347_p3 = scmp.lt.u32.totalorder %s1343_s18, %s1530_s2 }
  0x27   :  { %p1349_p4 = pnand %p1347_p3, %p1344_p2 }
  0x29   :  { %1352 = shalt.err (!%p1349_p4)
}
  0x2a   :  { %s1353_s23 = scalar_lea.vmem %s40_s6, 3072  ;;  %p1358_p6 = scmp.lt.s32.totalorder %s40_s6, %s40_s6 }
  0x2b   :  { %p1354_p5 = scmp.ne.s32.totalorder %s40_s6, %s1353_s23  ;;  %p1359_p7 = scmp.lt.s32.totalorder %s1353_s23, %s1353_s23 }
  0x2d   :  { %p1360_p8 = por %p1359_p7, %p1358_p6 }
  0x2f   :  { %p1361_p9 = pnand %p1360_p8, %p1354_p5 }
  0x31   :  { %1364 = shalt.err (!%p1361_p9)
}
  0x32   :  { %45 = dma.hbm_to_vmem [thread:$0]  %s1530_s2, 3072, %s40_s6, [#allocation6], %s1394_s25, %s1394_s25, %s1395_s26  }
  0x33   :  { %1387 = dma.done.wait [#allocation3], 896  }
  0x34   :  { %1388 = vsyncadd [#allocation3], 4294966400 }
  0x35   :  { %1389 = dma.done.wait [#allocation6], 9344  }
  0x36   :  { %1390 = vsyncadd [#allocation6], 4294957952  ;;  %v1226_v0 = vld [vmem:[#allocation5 + $0x40] sm:$0xff]   ;;  %v1230_v4 = vld [vmem:[#allocation5 + $0x48] sm:$0xff]   ;;  %v1398_v44 = vmov 0.0   ;;  %vm1399_vm0 = vmmov 0  }
  0x37   :  { %v1227_v1 = vld [vmem:[#allocation5] sm:$0xff]   ;;  %1057 = vmatprep.subr.bf16.mxu0 %v1226_v0  ;;  %v1231_v5 = vld [vmem:[#allocation5 + $0x8] sm:$0xff]   ;;  %v1234_v8 = vld [vmem:[#allocation5 + $0x50] sm:$0xff]   ;;  %vm469_vm1 = vcmask 130048  }
  0x38   :  { %v1228_v2 = vld [vmem:[#allocation5 + $0xc0] sm:$0xff]   ;;  %1058 = vmatpush3.bf16.msra.mxu0 %v1227_v1  ;;  %v1232_v6 = vld [vmem:[#allocation5 + $0xc8] sm:$0xff]   ;;  %v1235_v9 = vld [vmem:[#allocation5 + $0x10] sm:$0xff]  }
  0x39   :  { %v1229_v3 = vld [vmem:[#allocation5 + $0x80] sm:$0xff]   ;;  %1079 = vmatprep.subr.bf16.mxu1 %v1228_v2  ;;  %1059 = vmatprep.subr.bf16.mxu0 %v1230_v4  ;;  %v1233_v7 = vld [vmem:[#allocation5 + $0x88] sm:$0xff]   ;;  %v1236_v10 = vld [vmem:[#allocation5 + $0xd0] sm:$0xff]  }
  0x3a   :  { %1080 = vmatpush3.bf16.msra.mxu1 %v1229_v3  ;;  %v1237_v11 = vld [vmem:[#allocation5 + $0x90] sm:$0xff]   ;;  %v1238_v12 = vld [vmem:[#allocation5 + $0x58] sm:$0xff]   ;;  %v1242_v16 = vld [vmem:[#allocation5 + $0x60] sm:$0xff]  }
  0x3b   :  { %1081 = vmatprep.subr.bf16.mxu1 %v1232_v6  ;;  %v1239_v13 = vld [vmem:[#allocation5 + $0x18] sm:$0xff]   ;;  %v1243_v17 = vld [vmem:[#allocation5 + $0x20] sm:$0xff]   ;;  %v1246_v20 = vld [vmem:[#allocation5 + $0x68] sm:$0xff]  }
  0x3c   :  { %1060 = vmatpush3.bf16.msra.mxu0 %v1231_v5  ;;  %v1240_v14 = vld [vmem:[#allocation5 + $0xd8] sm:$0xff]   ;;  %v1244_v18 = vld [vmem:[#allocation5 + $0xe0] sm:$0xff]   ;;  %v1247_v21 = vld [vmem:[#allocation5 + $0x28] sm:$0xff]  }
  0x3d   :  { %1061 = vmatprep.subr.bf16.mxu0 %v1234_v8  ;;  %v1241_v15 = vld [vmem:[#allocation5 + $0x98] sm:$0xff]   ;;  %v1245_v19 = vld [vmem:[#allocation5 + $0xa0] sm:$0xff]   ;;  %v1248_v22 = vld [vmem:[#allocation5 + $0xe8] sm:$0xff]  }
  0x3e   :  { %1082 = vmatpush3.bf16.msra.mxu1 %v1233_v7  ;;  %v1249_v23 = vld [vmem:[#allocation5 + $0xa8] sm:$0xff]   ;;  %v1250_v24 = vld [vmem:[#allocation5 + $0x70] sm:$0xff]   ;;  %v1254_v28 = vld [vmem:[#allocation5 + $0x78] sm:$0xff]  }
  0x3f   :  { %1083 = vmatprep.subr.bf16.mxu1 %v1236_v10  ;;  %v1251_v25 = vld [vmem:[#allocation5 + $0x30] sm:$0xff]   ;;  %v1255_v29 = vld [vmem:[#allocation5 + $0x38] sm:$0xff]   ;;  %v58_v34 = vld [vmem:[#allocation2] sm:$0xff] }
  0x40   :  { %1062 = vmatpush3.bf16.msra.mxu0 %v1235_v9  ;;  %v1252_v26 = vld [vmem:[#allocation5 + $0xf0] sm:$0xff]   ;;  %v1256_v30 = vld [vmem:[#allocation5 + $0xf8] sm:$0xff]   ;;  %v65_v35 = vpack.c.bf16 %v58_v34, %v58_v34  ;;  %v1258_v36 = vld [vmem:[#allocation5 + $0x140] sm:$0xff]  }
  0x41   :  { %1063 = vmatprep.subr.bf16.mxu0 %v1238_v12  ;;  %v1253_v27 = vld [vmem:[#allocation5 + $0xb0] sm:$0xff]   ;;  %v1257_v33 = vld [vmem:[#allocation5 + $0xb8] sm:$0xff]   ;;  %v61_v37 = vld [vmem:[#allocation2 + $0x18] sm:$0xff] }
  0x42   :  { %1084 = vmatpush3.bf16.msra.mxu1 %v1237_v11  ;;  %v59_v31 = vld [vmem:[#allocation2 + $0x8] sm:$0xff]  ;;  %v68_v38 = vpack.c.bf16 %v61_v37, %v61_v37  ;;  %v1259_v39 = vld [vmem:[#allocation5 + $0x100] sm:$0xff]   ;;  %v60_v40 = vld [vmem:[#allocation2 + $0x10] sm:$0xff] }
  0x43   :  { %1085 = vmatprep.subr.bf16.mxu1 %v1240_v14  ;;  %v66_v32 = vpack.c.bf16 %v59_v31, %v59_v31  ;;  %v67_v41 = vpack.c.bf16 %v60_v40, %v60_v40  ;;  %v1260_v42 = vld [vmem:[#allocation5 + $0x148] sm:$0xff]   ;;  %v1262_v45 = vld [vmem:[#allocation5 + $0x150] sm:$0xff]   ;;  %v1264_v47 = vld [vmem:[#allocation5 + $0x158] sm:$0xff]   ;;  %v171_v14 = vlaneseq }
  0x44   :  { %1064 = vmatpush3.bf16.msra.mxu0 %v1239_v13  ;;  %545 = vmatprep.mubr.bf16.mxu1 %v68_v38  ;;  %v1261_v43 = vld [vmem:[#allocation5 + $0x108] sm:$0xff]   ;;  %v1263_v46 = vld [vmem:[#allocation5 + $0x110] sm:$0xff]   ;;  %v1265_v48 = vld [vmem:[#allocation5 + $0x118] sm:$0xff]  }
  0x45   :  { %1065 = vmatprep.subr.bf16.mxu0 %v1242_v16  ;;  %505 = vmatprep.mubr.bf16.mxu0 %v66_v32  ;;  %v1266_v49 = vld [vmem:[#allocation5 + $0x160] sm:$0xff]   ;;  %v1268_v51 = vld [vmem:[#allocation5 + $0x168] sm:$0xff]   ;;  %v63_v54 = vld [vmem:[#allocation2 + $0x28] sm:$0xff] }
  0x46   :  { %1086 = vmatpush3.bf16.msra.mxu1 %v1241_v15  ;;  %v1267_v50 = vld [vmem:[#allocation5 + $0x120] sm:$0xff]   ;;  %v1269_v52 = vld [vmem:[#allocation5 + $0x128] sm:$0xff]   ;;  %v1270_v55 = vld [vmem:[#allocation5 + $0x170] sm:$0xff]   ;;  %v70_v56 = vpack.c.bf16 %v63_v54, %v63_v54  ;;  %v1491_v15 = vshrl.u32 %v171_v14, 7 }
  0x47   :  { %1087 = vmatprep.subr.bf16.mxu1 %v1244_v18  ;;  %v1274_v53 = vld [vmem:[#allocation5 + $0x180] sm:$0xff]   ;;  %v64_v57 = vld [vmem:[#allocation2 + $0x30] sm:$0xff]  ;;  %v1271_v59 = vld [vmem:[#allocation5 + $0x130] sm:$0xff]  }
  0x48   :  { %1066 = vmatpush3.bf16.msra.mxu0 %v1243_v17  ;;  %v71_v58 = vpack.c.bf16 %v64_v57, %v64_v57  ;;  %v1272_v60 = vld [vmem:[#allocation5 + $0x178] sm:$0xff]   ;;  %v62_v62 = vld [vmem:[#allocation2 + $0x20] sm:$0xff]  ;;  %v1276_v1 = vld [vmem:[#allocation7 + $0x8] sm:$0xff]   ;;  %v173_v16 = vsub.s32 0, %v1491_v15 }
  0x49   :  { %1067 = vmatprep.subr.bf16.mxu0 %v1246_v20  ;;  %v1273_v61 = vld [vmem:[#allocation5 + $0x138] sm:$0xff]   ;;  %v69_v63 = vpack.c.bf16 %v62_v62, %v62_v62  ;;  %v1275_v0 = vld [vmem:[#allocation7] sm:$0xff]   ;;  %v1278_v3 = vld [vmem:[#allocation7 + $0x18] sm:$0xff]  }
  0x4a   :  { %1088 = vmatpush3.bf16.msra.mxu1 %v1245_v19  ;;  %v1277_v2 = vld [vmem:[#allocation7 + $0x10] sm:$0xff]   ;;  %v1279_v4 = vld [vmem:[#allocation7 + $0x20] sm:$0xff]   ;;  %v1280_v5 = vld [vmem:[#allocation7 + $0x28] sm:$0xff]  }
  0x4b   :  { %1089 = vmatprep.subr.bf16.mxu1 %v1248_v22  ;;  %v1281_v6 = vld [vmem:[#allocation7 + $0x30] sm:$0xff]   ;;  %v1282_v7 = vld [vmem:[#allocation7 + $0x38] sm:$0xff]   ;;  %v1283_v8 = vld [vmem:[#allocation7 + $0x40] sm:$0xff]  }
  0x4c   :  { %1068 = vmatpush3.bf16.msra.mxu0 %v1247_v21  ;;  %v1284_v9 = vld [vmem:[#allocation7 + $0x48] sm:$0xff]   ;;  %v1285_v10 = vld [vmem:[#allocation7 + $0x50] sm:$0xff]   ;;  %v1286_v11 = vld [vmem:[#allocation7 + $0x58] sm:$0xff]  }
  0x4d   :  { %1069 = vmatprep.subr.bf16.mxu0 %v1250_v24  ;;  %v1287_v12 = vld [vmem:[#allocation7 + $0x60] sm:$0xff]   ;;  %v1288_v13 = vld [vmem:[#allocation7 + $0x68] sm:$0xff]   ;;  %v1297_v62 = vld [vmem:[#allocation7 + $0xb0] sm:$0xff]  }
  0x4e   :  { %1090 = vmatpush3.bf16.msra.mxu1 %v1249_v23  ;;  %v1497_v17 = vld [vmem:[%s1531_s3] sm:$0xf]  ;;  %s1400_s3 = smov [#allocation8]  }
  0x4f   :  { %1091 = vmatprep.subr.bf16.mxu1 %v1252_v26  ;;  %v174_v19 = vrot.slane %v1497_v17, %v173_v16  ;;  %s973_s26 = sshll.u32 %s1400_s3, 4  ;;  %s974_s26 = int_to_ptr.vmem [resolvable:$true] %s973_s26 }
  0x50   :  { %1070 = vmatpush3.bf16.msra.mxu0 %v1251_v25  ;;  %s1365_s27 = scalar_lea.vmem %s974_s26, 128  ;;  %p1370_p11 = scmp.lt.s32.totalorder %s974_s26, %s974_s26 }
  0x51   :  { %1071 = vmatprep.subr.bf16.mxu0 %v1254_v28  ;;  %p1366_p10 = scmp.ne.s32.totalorder %s974_s26, %s1365_s27  ;;  %p1371_p12 = scmp.lt.s32.totalorder %s1365_s27, %s1365_s27 }
  0x52   :  { %1092 = vmatpush3.bf16.msra.mxu1 %v1253_v27 }
  0x53   :  { %1093 = vmatprep.subr.bf16.mxu1 %v1256_v30  ;;  %p1372_p13 = por %p1371_p12, %p1370_p11 }
  0x54   :  { %1072 = vmatpush3.bf16.msra.mxu0 %v1255_v29 }
  0x55   :  { %1101 = vmatprep.subr.bf16.mxu0 %v1258_v36  ;;  %p1373_p0 = pnand %p1372_p13, %p1366_p10 }
  0x56   :  { %1094 = vmatpush3.bf16.msra.mxu1 %v1257_v33 }
  0x57   :  { %506 = vmatmul.mubr.bf16.vlgmr.msra.gmra.mrb[0].mxu0 %v65_v35  ;;  %1152 = vmatprep.subr.bf16.mxu1 %v1398_v44 }
  0x58   :  { %1102 = vmatpush3.bf16.msra.mxu0 %v1259_v39  ;;  %585 = vmatprep.mubr.bf16.mxu0 %v70_v56 }
  0x59   :  { %546 = vmatmul.mubr.bf16.vlgmr.msra.gmra.mrb[0].mxu1 %v67_v41  ;;  %1103 = vmatprep.subr.bf16.mxu0 %v1260_v42 }
  0x5a   :  { %1154 = vmatprep.mubr.msk.bf16.mxu1 %vm1399_vm0, %v1398_v44  ;;  %1153 = vmatpush3.bf16.msra.mxu1 %v1274_v53  ;;  %v653_v53 = vsub.s32 1, %v1491_v15 }
  0x5b   :  { %1158 = vmatprep.subr.bf16.mxu1 %v1398_v44 }
  0x5c   :  { %1104 = vmatpush3.bf16.msra.mxu0 %v1261_v43  ;;  %v654_v54 = vrot.slane %v1497_v17, %v653_v53 }
  0x5d   :  { %1105 = vmatprep.subr.bf16.mxu0 %v1262_v45  ;;  %v1289_v45 = vld [vmem:[#allocation7 + $0x70] sm:$0xff]  }
  0x60   :  { %1106 = vmatpush3.bf16.msra.mxu0 %v1263_v46  ;;  %v1290_v46 = vld [vmem:[#allocation7 + $0x78] sm:$0xff]  }
  0x61   :  { %1107 = vmatprep.subr.bf16.mxu0 %v1264_v47  ;;  %1155 = vmatmul.mubr.msk.bf16.vlgmr.msra.gmra.mrb[4].mxu1 %vm469_vm1, %v71_v58  ;;  %v1291_v47 = vld [vmem:[#allocation7 + $0x80] sm:$0xff]  }
  0x62   :  { %1174 = vmatprep.mubr.msk.bf16.mxu1 %vm1399_vm0, %v1398_v44  ;;  %1159 = vmatpush3.bf16.msra.mxu1 %v1275_v0  ;;  %v764_v0 = vsub.s32 2, %v1491_v15 }
  0x63   :  { %1160 = vmatprep.subr.bf16.mxu1 %v1398_v44 }
  0x64   :  { %1108 = vmatpush3.bf16.msra.mxu0 %v1265_v48  ;;  %v1292_v48 = vld [vmem:[#allocation7 + $0x88] sm:$0xff]  }
  0x65   :  { %1109 = vmatprep.subr.bf16.mxu0 %v1266_v49  ;;  %v1293_v49 = vld [vmem:[#allocation7 + $0x90] sm:$0xff]  }
  0x66   :  { %1161 = vmatpush3.bf16.msra.mxu1 %v1276_v1  ;;  %v765_v1 = vrot.slane %v1497_v17, %v764_v0 }
  0x67   :  { %1162 = vmatprep.subr.bf16.mxu1 %v1398_v44 }
  0x68   :  { %1110 = vmatpush3.bf16.msra.mxu0 %v1267_v50  ;;  %v1294_v50 = vld [vmem:[#allocation7 + $0x98] sm:$0xff]  }
  0x69   :  { %1111 = vmatprep.subr.bf16.mxu0 %v1268_v51  ;;  %v1295_v51 = vld [vmem:[#allocation7 + $0xa0] sm:$0xff]  }
  0x6a   :  { %1163 = vmatpush3.bf16.msra.mxu1 %v1277_v2 }
  0x6b   :  { %1164 = vmatprep.subr.bf16.mxu1 %v1398_v44 }
  0x6c   :  { %1112 = vmatpush3.bf16.msra.mxu0 %v1269_v52  ;;  %v1296_v52 = vld [vmem:[#allocation7 + $0xa8] sm:$0xff]  }
  0x6d   :  { %1113 = vmatprep.subr.bf16.mxu0 %v1270_v55 }
  0x6e   :  { %1165 = vmatpush3.bf16.msra.mxu1 %v1278_v3 }
  0x6f   :  { %1166 = vmatprep.subr.bf16.mxu1 %v1398_v44 }
  0x70   :  { %1114 = vmatpush3.bf16.msra.mxu0 %v1271_v59 }
  0x71   :  { %1115 = vmatprep.subr.bf16.mxu0 %v1272_v60 }
  0x72   :  { %1167 = vmatpush3.bf16.msra.mxu1 %v1279_v4 }
  0x73   :  { %1168 = vmatprep.subr.bf16.mxu1 %v1398_v44 }
  0x74   :  { %1116 = vmatpush3.bf16.msra.mxu0 %v1273_v61 }
  0x75   :  { %1178 = vmatprep.subr.bf16.mxu0 %v1398_v44 }
  0x76   :  { %1169 = vmatpush3.bf16.msra.mxu1 %v1280_v5 }
  0x77   :  { %586 = vmatmul.mubr.bf16.vlgmr.msra.gmra.mrb[4].mxu0 %v69_v63  ;;  %1170 = vmatprep.subr.bf16.mxu1 %v1398_v44  ;;  %v1298_v63 = vld [vmem:[#allocation7 + $0xb8] sm:$0xff]  }
  0x78   :  { %1194 = vmatprep.mubr.msk.bf16.mxu0 %vm1399_vm0, %v1398_v44  ;;  %1179 = vmatpush3.bf16.msra.mxu0 %v1283_v8 }
  0x79   :  { %1180 = vmatprep.subr.bf16.mxu0 %v1398_v44 }
  0x7a   :  { %1171 = vmatpush3.bf16.msra.mxu1 %v1281_v6 }
  0x7b   :  { %1172 = vmatprep.subr.bf16.mxu1 %v1398_v44 }
  0x7c   :  { %1181 = vmatpush3.bf16.msra.mxu0 %v1284_v9  ;;  %v875_v9 = vsub.s32 3, %v1491_v15 }
  0x7d   :  { %1182 = vmatprep.subr.bf16.mxu0 %v1398_v44 }
  0x7e   :  { %1173 = vmatpush3.bf16.msra.mxu1 %v1282_v7 }
  0x7f   :  { %1198 = vmatprep.subr.bf16.mxu1 %v1398_v44 }
  0x80   :  { %1183 = vmatpush3.bf16.msra.mxu0 %v1285_v10  ;;  %v876_v10 = vrot.slane %v1497_v17, %v875_v9 }
  0x81   :  { %1184 = vmatprep.subr.bf16.mxu0 %v1398_v44 }
  0x84   :  { %1185 = vmatpush3.bf16.msra.mxu0 %v1286_v11 }
  0x85   :  { %1186 = vmatprep.subr.bf16.mxu0 %v1398_v44 }
  0x88   :  { %1187 = vmatpush3.bf16.msra.mxu0 %v1287_v12 }
  0x89   :  { %1188 = vmatprep.subr.bf16.mxu0 %v1398_v44 }
  0x8c   :  { %1189 = vmatpush3.bf16.msra.mxu0 %v1288_v13 }
  0x8d   :  { %1190 = vmatprep.subr.bf16.mxu0 %v1398_v44 }
  0x90   :  { %1191 = vmatpush3.bf16.msra.mxu0 %v1289_v45 }
  0x91   :  { %1192 = vmatprep.subr.bf16.mxu0 %v1398_v44 }
  0x94   :  { %1193 = vmatpush3.bf16.msra.mxu0 %v1290_v46 }
 0x12a   :  { %v1073_v18 = vpop.f32.mrb[0].mxu0 }
 0x12b   :  { %v1074_v20 = vpop.f32.mrb[1].mxu0 }
 0x12c   :  { %v1075_v21 = vadd.f32 %v1074_v20, %v1073_v18  ;;  %v1076_v22 = vpop.f32.mrb[2].mxu0  ;;  %v1095_v23 = vpop.f32.mrb[0].mxu1 }
 0x12d   :  { %v1077_v24 = vpop.f32.mrb[3].mxu0  ;;  %v1096_v26 = vpop.f32.mrb[1].mxu1 }
 0x12e   :  { %v508_v25 = vadd.f32 %v1075_v21, %v174_v19  ;;  %v1097_v27 = vadd.f32 %v1096_v26, %v1095_v23  ;;  %v1098_v28 = vpop.f32.mrb[2].mxu1 }
 0x12f   :  { %v1099_v29 = vpop.f32.mrb[3].mxu1 }
 0x130   :  { %v548_v30 = vadd.f32 %v1097_v27, %v508_v25 }
 0x134   :  { %v627_v31 = vpop.f32.mrb[4].mxu1 }
 0x135   :  { %v1156_v32 = vpop.f32.mrb[5].mxu1 }
 0x136   :  { %v630_v33 = vpop.f32.mrb[6].mxu1 }
 0x137   :  { %v1157_v34 = vpop.f32.mrb[7].mxu1 }
 0x14a   :  { %v1117_v35 = vpop.f32.mrb[4].mxu0 }
 0x14b   :  { %v1118_v36 = vpop.f32.mrb[5].mxu0 }
 0x14c   :  { %v1119_v37 = vadd.f32 %v1118_v36, %v1117_v35  ;;  %v1120_v38 = vpop.f32.mrb[6].mxu0 }
 0x14d   :  { %v1121_v39 = vpop.f32.mrb[7].mxu0 }
 0x14e   :  { %v588_v40 = vadd.f32 %v1119_v37, %v548_v30 }
 0x150   :  { %v628_v41 = vadd.f32 %v627_v31, %v588_v40 }
 0x152   :  { %v633_v42 = vmax.f32 %v628_v41, 0.0 }
 0x154   :  { %v634_v43 = vpack.c.bf16 %v633_v42, %v633_v42 }
 0x156   :  { %1175 = vmatmul.mubr.bf16.vlgmr.msra.gmra.mrb[8].mxu1 %v634_v43 }
 0x157   :  { %1214 = vmatprep.mubr.msk.bf16.mxu1 %vm1399_vm0, %v1398_v44  ;;  %1199 = vmatpush3.bf16.msra.mxu1 %v1291_v47 }
 0x158   :  { %1200 = vmatprep.subr.bf16.mxu1 %v1398_v44 }
 0x15b   :  { %1201 = vmatpush3.bf16.msra.mxu1 %v1292_v48 }
 0x15c   :  { %1202 = vmatprep.subr.bf16.mxu1 %v1398_v44 }
 0x15f   :  { %1203 = vmatpush3.bf16.msra.mxu1 %v1293_v49 }
 0x160   :  { %1204 = vmatprep.subr.bf16.mxu1 %v1398_v44 }
 0x163   :  { %1205 = vmatpush3.bf16.msra.mxu1 %v1294_v50 }
 0x164   :  { %1206 = vmatprep.subr.bf16.mxu1 %v1398_v44 }
 0x167   :  { %1207 = vmatpush3.bf16.msra.mxu1 %v1295_v51 }
 0x168   :  { %1208 = vmatprep.subr.bf16.mxu1 %v1398_v44 }
 0x16b   :  { %1209 = vmatpush3.bf16.msra.mxu1 %v1296_v52 }
 0x16c   :  { %1210 = vmatprep.subr.bf16.mxu1 %v1398_v44 }
 0x16f   :  { %1211 = vmatpush3.bf16.msra.mxu1 %v1297_v62 }
 0x170   :  { %1212 = vmatprep.subr.bf16.mxu1 %v1398_v44 }
 0x173   :  { %1213 = vmatpush3.bf16.msra.mxu1 %v1298_v63 }
 0x229   :  { %v737_v55 = vpop.f32.mrb[8].mxu1 }
 0x22a   :  { %v738_v56 = vadd.f32 %v737_v55, %v654_v54  ;;  %v1176_v57 = vpop.f32.mrb[9].mxu1 }
 0x22b   :  { %v740_v58 = vpop.f32.mrb[10].mxu1 }
 0x22c   :  { %v743_v59 = vmax.f32 %v738_v56, 0.0  ;;  %v1177_v60 = vpop.f32.mrb[11].mxu1 }
 0x22e   :  { %v744_v61 = vpack.c.bf16 %v743_v59, %v743_v59 }
 0x230   :  { %1195 = vmatmul.mubr.bf16.vlgmr.msra.gmra.mrb[8].mxu0 %v744_v61 }
 0x303   :  { %v848_v2 = vpop.f32.mrb[8].mxu0 }
 0x304   :  { %v849_v3 = vadd.f32 %v848_v2, %v765_v1  ;;  %v1196_v4 = vpop.f32.mrb[9].mxu0 }
 0x305   :  { %v851_v5 = vpop.f32.mrb[10].mxu0 }
 0x306   :  { %v854_v6 = vmax.f32 %v849_v3, 0.0  ;;  %v1197_v7 = vpop.f32.mrb[11].mxu0 }
 0x308   :  { %v855_v8 = vpack.c.bf16 %v854_v6, %v854_v6 }
 0x30a   :  { %1215 = vmatmul.mubr.bf16.vlgmr.msra.gmra.mrb[12].mxu1 %v855_v8 }
 0x3dd   :  { %v959_v11 = vpop.f32.mrb[12].mxu1 }
 0x3de   :  { %v960_v44 = vadd.f32 %v959_v11, %v876_v10  ;;  %v1216_v12 = vpop.f32.mrb[13].mxu1 }
 0x3df   :  { %v962_v13 = vpop.f32.mrb[14].mxu1 }
 0x3e0   :  { %v965_v14 = vmax.f32 %v960_v44, 0.0  ;;  %v1217_v16 = vpop.f32.mrb[15].mxu1 }
 0x3e2   :  { %966 = vst [vmem:[#allocation8] sm:$0xff] %v965_v14 }
 0x3e3   :  { %1376 = shalt.err (!%p1373_p0)
}
 0x3e4   :  { %s1377_s30 = scalar_lea.hbm %s1532_s4, 128 }
 0x3e5   :  { %p1378_p1 = scmp.ne.s32.totalorder %s1532_s4, %s1377_s30  ;;  %p1381_p2 = scmp.lt.u32.totalorder %s1377_s30, %s1532_s4 }
 0x3e7   :  { %p1383_p3 = pnand %p1381_p2, %p1378_p1 }
 0x3e9   :  { %1386 = shalt.err (!%p1383_p3)
}
 0x3ea   :  { %976 = dma.vmem_to_hbm [thread:$0]  %s974_s26, 128, %s1532_s4, [#allocation4]  }
 0x3eb   :  { %1391 = dma.done.wait [#allocation4], 128  }
 0x3ec   :  { %1392 = vsyncadd [#allocation4], 4294967168 }
 0x3ed   :  { %980 = vsyncpa [#allocation3], 1 }
 0x3ee   :  { %981 = vsyncpa [#allocation6], 1 }
 0x3ef   :  { %982 = vsyncpa [#allocation4], 1 }

</bundles_post_ra>
